<compile_context>
chip_gen: v7x
topology: tpu7x:2x2x1
jax: 0.10.0
libtpu: 0.0.40
codegen_flags: <defaults>
</compile_context>

<pallas_src>
import jax
import jax.numpy as jnp
from jax.experimental import pallas as pl
from jax.experimental.pallas import tpu as pltpu

LANE = 128                      # TPU lane width (hidden-dim packing target)
SUBLANE = 8                     # sublane granularity for batch tiles
MAX_TILE_B = 2048               # batch rows per grid step (large-B cap)


def _round_up(n, m):
    return ((n + m - 1) // m) * m


def _mlp_kernel(x_ref, w1_ref, b1_ref, w2_ref, b2_ref, w3_ref, b3_ref, out_ref):
    # hidden layer 1: relu(x @ W1 + b1)
    h1 = jnp.maximum(
        jnp.dot(x_ref[...], w1_ref[...], preferred_element_type=jnp.float32)
        + b1_ref[...],
        0.0,
    )
    # hidden layer 2: relu(h1 @ W2 + b2)
    h2 = jnp.maximum(
        jnp.dot(h1, w2_ref[...], preferred_element_type=jnp.float32)
        + b2_ref[...],
        0.0,
    )
    # logits: h2 @ W3 + b3  (narrow output, masked store of out_size columns)
    out = (
        jnp.dot(h2, w3_ref[...], preferred_element_type=jnp.float32)
        + b3_ref[...]
    )
    out_ref[...] = out.astype(out_ref.dtype)


def init_discrete_posterior_params(key, input_size=20, hidden_size=64,
                                   output_size=2):
    """nn.Linear-default init: U(-1/sqrt(fan_in), 1/sqrt(fan_in)) for W and b.
    Weights stored pre-transposed as (in_features, out_features)."""
    k1, k2, k3, k4, k5, k6 = jax.random.split(key, 6)

    def linear_init(kw, kb, fan_in, fan_out):
        bound = 1.0 / jnp.sqrt(fan_in)
        w = jax.random.uniform(kw, (fan_in, fan_out), jnp.float32, -bound, bound)
        b = jax.random.uniform(kb, (1, fan_out), jnp.float32, -bound, bound)
        return w, b

    w1, b1 = linear_init(k1, k2, input_size, hidden_size)
    w2, b2 = linear_init(k3, k4, hidden_size, hidden_size)
    w3, b3 = linear_init(k5, k6, hidden_size, output_size)
    return dict(w1=w1, b1=b1, w2=w2, b2=b2, w3=w3, b3=b3)


def prepare_padded_params(params):
    """Zero-pad ONLY the hidden feature dim to the 128-lane width.

    Done once, offline.  Zero-padded hidden columns stay exactly zero through
    relu, and the matching zero rows of W2 / W3 contribute nothing downstream,
    so results are bit-identical.  The output dim (logits) is left narrow so
    the kernel never writes a padded output slab to HBM.
    """
    in_size, hidden = params["w1"].shape
    out_size = params["w3"].shape[1]
    h_pad = _round_up(hidden, LANE)

    def pad2(a, rows, cols):
        return jnp.pad(a, ((0, rows - a.shape[0]), (0, cols - a.shape[1])))

    return dict(
        w1=pad2(params["w1"], in_size, h_pad),
        b1=pad2(params["b1"], 1, h_pad),
        w2=pad2(params["w2"], h_pad, h_pad),
        b2=pad2(params["b2"], 1, h_pad),
        w3=pad2(params["w3"], h_pad, out_size),   # pad contraction dim only
        b3=params["b3"],                          # (1, out_size), unpadded
    )


@jax.jit
def _forward_impl(x, w1, b1, w2, b2, w3, b3):
    B, in_size = x.shape
    h_pad = w1.shape[1]
    out_size = w3.shape[1]

    # Batch tile: big enough to amortize per-step overhead, sublane-aligned,
    # but capped at ceil(B/2) so the grid has >=2 steps whenever B > SUBLANE
    # (lets the "parallel" axis shard across both v7x TensorCores).
    if B <= SUBLANE:
        tile_b = SUBLANE
    else:
        tile_b = min(MAX_TILE_B, _round_up((B + 1) // 2, SUBLANE))

    # No explicit batch padding: cdiv grid + ragged tail block.  Safe because
    # every op is row-independent and rows >= B are never written back.
    grid = (pl.cdiv(B, tile_b),)

    resident = lambda shape: pl.BlockSpec(shape, lambda i: (0, 0))

    out = pl.pallas_call(
        _mlp_kernel,
        out_shape=jax.ShapeDtypeStruct((B, out_size), jnp.float32),
        grid=grid,
        in_specs=[
            pl.BlockSpec((tile_b, in_size), lambda i: (i, 0)),   # x: streamed
            resident((in_size, h_pad)),                          # W1
            resident((1, h_pad)),                                # b1
            resident((h_pad, h_pad)),                            # W2
            resident((1, h_pad)),                                # b2
            resident((h_pad, out_size)),                         # W3 (narrow N)
            resident((1, out_size)),                             # b3
        ],
        out_specs=pl.BlockSpec((tile_b, out_size), lambda i: (i, 0)),
        compiler_params=pltpu.CompilerParams(
            dimension_semantics=("parallel",),
        ),
    )(x, w1, b1, w2, b2, w3, b3)

    return out


def discrete_posterior_forward(x, padded_params):
    """x: (B, input_size) f32 -> logits (B, output_size) f32."""
    p = padded_params
    return _forward_impl(x, p["w1"], p["b1"], p["w2"], p["b2"], p["w3"], p["b3"])


if __name__ == "__main__":
    input_size, hidden_size, output_size, batch = 20, 64, 2, 8

    key = jax.random.PRNGKey(0)
    kx, kp = jax.random.split(key)
    x = jax.random.normal(kx, (batch, input_size), jnp.float32)
    params = init_discrete_posterior_params(kp, input_size, hidden_size,
                                            output_size)
    padded = prepare_padded_params(params)

    out = discrete_posterior_forward(x, padded)
    jax.block_until_ready(out)

    # Pure-JAX reference (un-padded weights).
    h1 = jnp.maximum(x @ params["w1"] + params["b1"], 0.0)
    h2 = jnp.maximum(h1 @ params["w2"] + params["b2"], 0.0)
    ref = h2 @ params["w3"] + params["b3"]
    assert out.shape == (batch, output_size)
    assert jnp.allclose(out, ref, atol=1e-5), (out, ref)

    print("KERNEL_OK")
</pallas_src>

<mosaic_0001>
module attributes {stable_mosaic.version = 11 : i64} {
  func.func @_mlp_kernel(%arg0: i32, %arg1: memref<8x20xf32, #tpu.memory_space<vmem>>, %arg2: memref<20x128xf32, #tpu.memory_space<vmem>>, %arg3: memref<1x128xf32, #tpu.memory_space<vmem>>, %arg4: memref<128x128xf32, #tpu.memory_space<vmem>>, %arg5: memref<1x128xf32, #tpu.memory_space<vmem>>, %arg6: memref<128x2xf32, #tpu.memory_space<vmem>>, %arg7: memref<1x2xf32, #tpu.memory_space<vmem>>, %arg8: memref<8x2xf32, #tpu.memory_space<vmem>>) attributes {dimension_semantics = [#tpu.dimension_semantics<parallel>], iteration_bounds = array<i64: 1>, scalar_prefetch = 0 : i64, scratch_operands = 0 : i64, tpu.core_type = #tpu.core_type<tc>, window_params = [{transform_indices = @transform_0, window_bounds = array<i64: 8, 20>}, {pipeline_mode = #tpu.pipeline_mode<synchronous>, transform_indices = @transform_1, window_bounds = array<i64: 20, 128>}, {pipeline_mode = #tpu.pipeline_mode<synchronous>, transform_indices = @transform_2, window_bounds = array<i64: 1, 128>}, {pipeline_mode = #tpu.pipeline_mode<synchronous>, transform_indices = @transform_3, window_bounds = array<i64: 128, 128>}, {pipeline_mode = #tpu.pipeline_mode<synchronous>, transform_indices = @transform_4, window_bounds = array<i64: 1, 128>}, {pipeline_mode = #tpu.pipeline_mode<synchronous>, transform_indices = @transform_5, window_bounds = array<i64: 128, 2>}, {pipeline_mode = #tpu.pipeline_mode<synchronous>, transform_indices = @transform_6, window_bounds = array<i64: 1, 2>}, {transform_indices = @transform_7, window_bounds = array<i64: 8, 2>}]} {
    %c0 = arith.constant 0 : index
    %c0_0 = arith.constant 0 : index
    %0 = vector.load %arg1[%c0, %c0_0] : memref<8x20xf32, #tpu.memory_space<vmem>>, vector<8x20xf32>
    %c0_1 = arith.constant 0 : index
    %c0_2 = arith.constant 0 : index
    %1 = vector.load %arg2[%c0_1, %c0_2] : memref<20x128xf32, #tpu.memory_space<vmem>>, vector<20x128xf32>
    %cst = arith.constant dense<0.000000e+00> : vector<8x128xf32>
    %2 = tpu.matmul %0, %1, %cst {dimension_numbers = #tpu.dot_dimension_numbers<[1], [0], [0], [1], [0, 0, 1, 1], [], []>} : vector<8x20xf32>, vector<20x128xf32>, vector<8x128xf32> -> vector<8x128xf32>
    %c0_3 = arith.constant 0 : index
    %c0_4 = arith.constant 0 : index
    %3 = vector.load %arg3[%c0_3, %c0_4] : memref<1x128xf32, #tpu.memory_space<vmem>>, vector<1x128xf32>
    %4 = vector.broadcast %3 : vector<1x128xf32> to vector<8x128xf32>
    %5 = arith.addf %2, %4 : vector<8x128xf32>
    %cst_5 = arith.constant 0.000000e+00 : f32
    %6 = vector.broadcast %cst_5 : f32 to vector<8x128xf32>
    %7 = arith.maximumf %5, %6 : vector<8x128xf32>
    %c0_6 = arith.constant 0 : index
    %c0_7 = arith.constant 0 : index
    %8 = vector.load %arg4[%c0_6, %c0_7] : memref<128x128xf32, #tpu.memory_space<vmem>>, vector<128x128xf32>
    %cst_8 = arith.constant dense<0.000000e+00> : vector<8x128xf32>
    %9 = tpu.matmul %7, %8, %cst_8 {dimension_numbers = #tpu.dot_dimension_numbers<[1], [0], [0], [1], [0, 0, 1, 1], [], []>} : vector<8x128xf32>, vector<128x128xf32>, vector<8x128xf32> -> vector<8x128xf32>
    %c0_9 = arith.constant 0 : index
    %c0_10 = arith.constant 0 : index
    %10 = vector.load %arg5[%c0_9, %c0_10] : memref<1x128xf32, #tpu.memory_space<vmem>>, vector<1x128xf32>
    %11 = vector.broadcast %10 : vector<1x128xf32> to vector<8x128xf32>
    %12 = arith.addf %9, %11 : vector<8x128xf32>
    %cst_11 = arith.constant 0.000000e+00 : f32
    %13 = vector.broadcast %cst_11 : f32 to vector<8x128xf32>
    %14 = arith.maximumf %12, %13 : vector<8x128xf32>
    %c0_12 = arith.constant 0 : index
    %c0_13 = arith.constant 0 : index
    %15 = vector.load %arg6[%c0_12, %c0_13] : memref<128x2xf32, #tpu.memory_space<vmem>>, vector<128x2xf32>
    %cst_14 = arith.constant dense<0.000000e+00> : vector<8x2xf32>
    %16 = tpu.matmul %14, %15, %cst_14 {dimension_numbers = #tpu.dot_dimension_numbers<[1], [0], [0], [1], [0, 0, 1, 1], [], []>} : vector<8x128xf32>, vector<128x2xf32>, vector<8x2xf32> -> vector<8x2xf32>
    %c0_15 = arith.constant 0 : index
    %c0_16 = arith.constant 0 : index
    %17 = vector.load %arg7[%c0_15, %c0_16] : memref<1x2xf32, #tpu.memory_space<vmem>>, vector<1x2xf32>
    %18 = vector.broadcast %17 : vector<1x2xf32> to vector<8x2xf32>
    %19 = arith.addf %16, %18 : vector<8x2xf32>
    %c0_17 = arith.constant 0 : index
    %c0_18 = arith.constant 0 : index
    %20 = vector.load %arg8[%c0_17, %c0_18] : memref<8x2xf32, #tpu.memory_space<vmem>>, vector<8x2xf32>
    tpu.vector_store %arg8[%c0_17, %c0_18], %19 {strides = array<i32>} : memref<8x2xf32, #tpu.memory_space<vmem>>, vector<8x2xf32>,
    return
  }
  func.func @transform_0(%arg0: i32) -> (i32, i32) {
    %c0_i32 = arith.constant 0 : i32
    %c0_i32_0 = arith.constant 0 : i32
    return %arg0, %c0_i32 : i32, i32
  }
  func.func @transform_1(%arg0: i32) -> (i32, i32) {
    %c0_i32 = arith.constant 0 : i32
    %c0_i32_0 = arith.constant 0 : i32
    %c0_i32_1 = arith.constant 0 : i32
    return %c0_i32, %c0_i32_0 : i32, i32
  }
  func.func @transform_2(%arg0: i32) -> (i32, i32) {
    %c0_i32 = arith.constant 0 : i32
    %c0_i32_0 = arith.constant 0 : i32
    %c0_i32_1 = arith.constant 0 : i32
    return %c0_i32, %c0_i32_0 : i32, i32
  }
  func.func @transform_3(%arg0: i32) -> (i32, i32) {
    %c0_i32 = arith.constant 0 : i32
    %c0_i32_0 = arith.constant 0 : i32
    %c0_i32_1 = arith.constant 0 : i32
    return %c0_i32, %c0_i32_0 : i32, i32
  }
  func.func @transform_4(%arg0: i32) -> (i32, i32) {
    %c0_i32 = arith.constant 0 : i32
    %c0_i32_0 = arith.constant 0 : i32
    %c0_i32_1 = arith.constant 0 : i32
    return %c0_i32, %c0_i32_0 : i32, i32
  }
  func.func @transform_5(%arg0: i32) -> (i32, i32) {
    %c0_i32 = arith.constant 0 : i32
    %c0_i32_0 = arith.constant 0 : i32
    %c0_i32_1 = arith.constant 0 : i32
    return %c0_i32, %c0_i32_0 : i32, i32
  }
  func.func @transform_6(%arg0: i32) -> (i32, i32) {
    %c0_i32 = arith.constant 0 : i32
    %c0_i32_0 = arith.constant 0 : i32
    %c0_i32_1 = arith.constant 0 : i32
    return %c0_i32, %c0_i32_0 : i32, i32
  }
  func.func @transform_7(%arg0: i32) -> (i32, i32) {
    %c0_i32 = arith.constant 0 : i32
    %c0_i32_0 = arith.constant 0 : i32
    return %arg0, %c0_i32 : i32, i32
  }
}

</mosaic_0001>

<bundles_post_ra>
// kernel: _forward_impl.1
= control target key start
LH: loop header
LB: loop body
LE: loop exit
PB: predicated region body
PF: predicated region fallthrough
CT: control target
= control target key end

     0   :  { %12 = vsyncpa [#allocation3], 0  ;;  %s527_s24 = smov [#allocation2]   ;;  %s716_s0 = inlined_call_operand.vmem [shape: f32[8,20], index: 0, kind: input, shape index: {}]   ;;  %s717_s1 = inlined_call_operand.hbm [shape: f32[20,128], index: 1, kind: input, shape index: {}]   ;;  %s718_s2 = inlined_call_operand.vmem [shape: f32[1,128], index: 2, kind: input, shape index: {}]   ;;  %s719_s3 = inlined_call_operand.vmem [shape: f32[128,128], index: 3, kind: input, shape index: {}]   ;;  %s720_s4 = inlined_call_operand.vmem [shape: f32[1,128], index: 4, kind: input, shape index: {}]   ;;  %s721_s5 = inlined_call_operand.vmem [shape: f32[128,2], index: 5, kind: input, shape index: {}]   ;;  %s722_s6 = inlined_call_operand.vmem [shape: f32[1,2], index: 6, kind: input, shape index: {}]   ;;  %s723_s7 = inlined_call_operand.vmem [shape: f32[8,2], index: 7, kind: output, shape index: {}]  }
   0x1   :  { %s20_s25 = sshll.u32 %s527_s24, 4  ;;  %s503_s28 = scalar_lea.hbm %s717_s1, 384  ;;  %s21_s25 = int_to_ptr.vmem [resolvable:$true] %s20_s25 }
   0x2   :  { %p504_p0 = scmp.ne.s32.totalorder %s717_s1, %s503_s28  ;;  %p507_p1 = scmp.lt.u32.totalorder %s503_s28, %s717_s1 }
   0x4   :  { %p509_p2 = pnand %p507_p1, %p504_p0 }
   0x6   :  { %512 = shalt.err (!%p509_p2)
}
   0x7   :  { %s513_s10 = scalar_lea.vmem %s21_s25, 384  ;;  %p518_p4 = scmp.lt.s32.totalorder %s21_s25, %s21_s25 }
   0x8   :  { %p514_p3 = scmp.ne.s32.totalorder %s21_s25, %s513_s10  ;;  %p519_p5 = scmp.lt.s32.totalorder %s513_s10, %s513_s10 }
   0xa   :  { %p520_p6 = por %p519_p5, %p518_p4 }
   0xc   :  { %p521_p7 = pnand %p520_p6, %p514_p3 }
   0xe   :  { %524 = shalt.err (!%p521_p7)
}
   0xf   :  { %s528_s11 = smov 128   ;;  %s529_s12 = smov 8  }
  0x10   :  { %26 = dma.hbm_to_vmem [thread:$0]  %s717_s1, 384, %s21_s25, [#allocation3], %s528_s11, %s528_s11, %s529_s12  }
  0x11   :  { %525 = dma.done.wait [#allocation3], 384  }
  0x12   :  { %526 = vsyncadd [#allocation3], 4294966912  ;;  %v530_v0 = vmov 0.0|0.0   ;;  %vm531_vm0 = vmmov 0   ;;  %v532_v1 = vmov 0.0   ;;  %v41_v2 = vld [vmem:[#allocation2] sm:$0xff] }
  0x13   :  { %446 = vmatprep.subr.bf16.mxu0 %v530_v0  ;;  %373 = vmatprep.mubr.msk.f32.mxu0 %vm531_vm0, %v532_v1  ;;  %v42_v3 = vld [vmem:[#allocation2 + $0x8] sm:$0xff]  ;;  %v130_v5 = vld [vmem:[%s719_s3] sm:$0xff]  ;;  %v132_v8 = vld [vmem:[%s719_s3 + $0x10] sm:$0xff]  ;;  %vm55_vm1 = vcmask 1043456   ;;  %vm51_vm2 = vcmask 162816   ;;  %vm317_vm3 = vcmask 15360  }
  0x14   :  { %449 = vmatprep.subr.bf16.mxu1 %v530_v0  ;;  %408 = vmatprep.mubr.msk.f32.mxu1 %vm531_vm0, %v532_v1  ;;  %v447_v4 = vpack.c.bf16 %v42_v3, %v41_v2  ;;  %v131_v6 = vld [vmem:[%s719_s3 + $0x8] sm:$0xff]  ;;  %v133_v9 = vld [vmem:[%s719_s3 + $0x18] sm:$0xff]  ;;  %v43_v10 = vld [vmem:[#allocation2 + $0x10] sm:$0xf] }
  0x15   :  { %v450_v7 = vpack.c.bf16 %v131_v6, %v130_v5  ;;  %v453_v11 = vpack.c.bf16 %v133_v9, %v132_v8  ;;  %v40_v12 = vld [vmem:[%s716_s0] sm:$0xff]  ;;  %v135_v14 = vld [vmem:[%s719_s3 + $0x28] sm:$0xff]  ;;  %v136_v16 = vld [vmem:[%s719_s3 + $0x30] sm:$0xff] }
  0x16   :  { %448 = vmatpush3.bf16.msra.mxu0 %v447_v4  ;;  %v134_v13 = vld [vmem:[%s719_s3 + $0x20] sm:$0xff]  ;;  %v137_v17 = vld [vmem:[%s719_s3 + $0x38] sm:$0xff]  ;;  %v139_v20 = vld [vmem:[%s719_s3 + $0x48] sm:$0xff] }
  0x17   :  { %371 = vmatprep.subr.mxu0 %v532_v1  ;;  %451 = vmatpush3.bf16.msra.mxu1 %v450_v7  ;;  %v456_v15 = vpack.c.bf16 %v135_v14, %v134_v13  ;;  %v459_v18 = vpack.c.bf16 %v137_v17, %v136_v16  ;;  %v138_v19 = vld [vmem:[%s719_s3 + $0x40] sm:$0xff]  ;;  %v140_v22 = vld [vmem:[%s719_s3 + $0x50] sm:$0xff]  ;;  %v141_v23 = vld [vmem:[%s719_s3 + $0x58] sm:$0xff] }
  0x18   :  { %452 = vmatprep.subr.bf16.mxu1 %v530_v0  ;;  %v462_v21 = vpack.c.bf16 %v139_v20, %v138_v19  ;;  %v465_v24 = vpack.c.bf16 %v141_v23, %v140_v22  ;;  %v142_v25 = vld [vmem:[%s719_s3 + $0x60] sm:$0xff]  ;;  %v143_v26 = vld [vmem:[%s719_s3 + $0x68] sm:$0xff]  ;;  %v144_v28 = vld [vmem:[%s719_s3 + $0x70] sm:$0xff] }
  0x19   :  { %v468_v27 = vpack.c.bf16 %v143_v26, %v142_v25  ;;  %v145_v29 = vld [vmem:[%s719_s3 + $0x78] sm:$0xff]  ;;  %v224_v31 = vld [vmem:[%s721_s5] sm:$0xff]  ;;  %v225_v32 = vld [vmem:[%s721_s5 + $0x8] sm:$0xff] }
  0x1a   :  { %372 = vmatpush3.msk.msra.mxu0 %vm55_vm1, %v43_v10  ;;  %v471_v30 = vpack.c.bf16 %v145_v29, %v144_v28  ;;  %v226_v33 = vld [vmem:[%s721_s5 + $0x10] sm:$0xff]  ;;  %v474_v34 = vpack.c.bf16 %v225_v32, %v224_v31  ;;  %v227_v35 = vld [vmem:[%s721_s5 + $0x18] sm:$0xff]  ;;  %v228_v37 = vld [vmem:[%s721_s5 + $0x20] sm:$0xff] }
  0x1b   :  { %374 = vmatmul.mubr.msk.f32.vlgmr.msra.gmra.mrb[0].mxu0 %vm51_vm2, %v40_v12  ;;  %454 = vmatpush3.bf16.msra.mxu1 %v453_v11  ;;  %v477_v36 = vpack.c.bf16 %v227_v35, %v226_v33  ;;  %v229_v38 = vld [vmem:[%s721_s5 + $0x28] sm:$0xff]  ;;  %v230_v40 = vld [vmem:[%s721_s5 + $0x30] sm:$0xff]  ;;  %v231_v41 = vld [vmem:[%s721_s5 + $0x38] sm:$0xff] }
  0x1c   :  { %455 = vmatprep.subr.bf16.mxu1 %v530_v0  ;;  %473 = vmatprep.subr.bf16.mxu0 %v530_v0  ;;  %v480_v39 = vpack.c.bf16 %v229_v38, %v228_v37  ;;  %v483_v42 = vpack.c.bf16 %v231_v41, %v230_v40  ;;  %v232_v43 = vld [vmem:[%s721_s5 + $0x40] sm:$0xff]  ;;  %v233_v44 = vld [vmem:[%s721_s5 + $0x48] sm:$0xff]  ;;  %v234_v46 = vld [vmem:[%s721_s5 + $0x50] sm:$0xff] }
  0x1d   :  { %443 = vmatprep.mubr.msk.f32.mxu0 %vm531_vm0, %v532_v1  ;;  %475 = vmatpush3.bf16.msra.mxu0 %v474_v34  ;;  %v486_v45 = vpack.c.bf16 %v233_v44, %v232_v43  ;;  %v235_v47 = vld [vmem:[%s721_s5 + $0x58] sm:$0xff]  ;;  %v236_v49 = vld [vmem:[%s721_s5 + $0x60] sm:$0xff]  ;;  %v237_v50 = vld [vmem:[%s721_s5 + $0x68] sm:$0xff] }
  0x1e   :  { %476 = vmatprep.subr.bf16.mxu0 %v530_v0  ;;  %v489_v48 = vpack.c.bf16 %v235_v47, %v234_v46  ;;  %v492_v51 = vpack.c.bf16 %v237_v50, %v236_v49  ;;  %v324_v52 = vld [vmem:[%s718_s2] ss:$0 sm:$0xff]  ;;  %v238_v57 = vld [vmem:[%s721_s5 + $0x70] sm:$0xff]  ;;  %v239_v58 = vld [vmem:[%s721_s5 + $0x78] sm:$0xff] }
  0x1f   :  { %457 = vmatpush3.bf16.msra.mxu1 %v456_v15  ;;  %v495_v59 = vpack.c.bf16 %v239_v58, %v238_v57  ;;  %v327_v60 = vld [vmem:[%s720_s4] ss:$0 sm:$0xff] }
  0x20   :  { %458 = vmatprep.subr.bf16.mxu1 %v530_v0  ;;  %v328_v1 = vld [vmem:[%s722_s6] ss:$0 sm:$0xff] }
  0x21   :  { %478 = vmatpush3.bf16.msra.mxu0 %v477_v36 }
  0x22   :  { %479 = vmatprep.subr.bf16.mxu0 %v530_v0 }
  0x23   :  { %460 = vmatpush3.bf16.msra.mxu1 %v459_v18 }
  0x24   :  { %461 = vmatprep.subr.bf16.mxu1 %v530_v0 }
  0x25   :  { %481 = vmatpush3.bf16.msra.mxu0 %v480_v39 }
  0x26   :  { %482 = vmatprep.subr.bf16.mxu0 %v530_v0 }
  0x27   :  { %463 = vmatpush3.bf16.msra.mxu1 %v462_v21 }
  0x28   :  { %464 = vmatprep.subr.bf16.mxu1 %v530_v0 }
  0x29   :  { %484 = vmatpush3.bf16.msra.mxu0 %v483_v42 }
  0x2a   :  { %485 = vmatprep.subr.bf16.mxu0 %v530_v0 }
  0x2b   :  { %466 = vmatpush3.bf16.msra.mxu1 %v465_v24 }
  0x2c   :  { %467 = vmatprep.subr.bf16.mxu1 %v530_v0 }
  0x2d   :  { %487 = vmatpush3.bf16.msra.mxu0 %v486_v45 }
  0x2e   :  { %488 = vmatprep.subr.bf16.mxu0 %v530_v0 }
  0x2f   :  { %469 = vmatpush3.bf16.msra.mxu1 %v468_v27 }
  0x30   :  { %470 = vmatprep.subr.bf16.mxu1 %v530_v0 }
  0x31   :  { %490 = vmatpush3.bf16.msra.mxu0 %v489_v48 }
  0x32   :  { %491 = vmatprep.subr.bf16.mxu0 %v530_v0 }
  0x33   :  { %472 = vmatpush3.bf16.msra.mxu1 %v471_v30 }
  0x35   :  { %493 = vmatpush3.bf16.msra.mxu0 %v492_v51 }
  0x36   :  { %494 = vmatprep.subr.bf16.mxu0 %v530_v0 }
  0x39   :  { %496 = vmatpush3.bf16.msra.mxu0 %v495_v59 }
  0xee   :  { %v125_v53 = vpop.f32.mrb[0].mxu0 }
  0xef   :  { %v126_v54 = vadd.f32 %v324_v52, %v125_v53  ;;  %v375_v55 = vpop.f32.mrb[1].mxu0 }
  0xf1   :  { %v129_v56 = vmax.f32 %v126_v54, 0.0 }
  0xf3   :  { %409 = vmatmul.mubr.f32.vlgmr.msra.gmra.mrb[0].mxu1 %v129_v56 }
 0x1c6   :  { %v219_v61 = vpop.f32.mrb[0].mxu1 }
 0x1c7   :  { %v220_v62 = vadd.f32 %v327_v60, %v219_v61  ;;  %v410_v63 = vpop.f32.mrb[1].mxu1 }
 0x1c9   :  { %v223_v0 = vmax.f32 %v220_v62, 0.0 }
 0x1cb   :  { %444 = vmatmul.mubr.f32.vlgmr.msra.gmra.mrb[2].mxu0 %v223_v0 }
 0x29e   :  { %v313_v2 = vpop.f32.mrb[2].mxu0 }
 0x29f   :  { %v314_v3 = vadd.f32 %v328_v1, %v313_v2  ;;  %v445_v4 = vpop.f32.mrb[3].mxu0 }
 0x2a1   :  { %318 = vst.msk [vmem:[%s723_s7] sm:$0xff] %vm317_vm3, %v314_v3 }
 0x2a2   :  { %323 = vsyncpa [#allocation3], 1 }

</bundles_post_ra>
